<compile_context>
chip_gen: v5e
topology: v5e:2x2
jax: 0.10.0
libtpu: 0.0.40
codegen_flags: <defaults>
</compile_context>

<pallas_src>
import functools

import jax
import jax.numpy as jnp
import numpy as np
from jax.experimental import pallas as pl
from jax.experimental.pallas import tpu as pltpu


def decouple_kernel(x_ref, m_ref, wf_ref, wr_ref, bf_ref, br_ref, o_ref,
                    *, seq_len):
    # x_ref : (C, Lb)   bf16   C = 2*dim channels, Lb = block_b*seq_len lanes
    # m_ref : (1, Lb)   f32    valid-length mask
    # wf_ref/wr_ref: (3*dim, dim) bf16, rows = [tap0 | tap1 | tap2], each tap
    #                block ordered [branchA; branchB] (branch-major, then out-ch)
    # bf_ref/br_ref: (dim, 1) f32 fused biases
    # o_ref : (C, Lb)   f32
    x = x_ref[...]
    m = m_ref[...]
    C, Lb = x.shape
    dim = C // 2

    # Position within each folded sequence (a block always starts at a
    # sequence boundary).  Used to zero the conv-padding columns of the
    # shifted outputs and to stop rolls from leaking across sequences.
    col = jax.lax.broadcasted_iota(jnp.int32, (1, Lb), 1)
    t = col % seq_len
    nf = (t != 0).astype(jnp.float32)             # left tap valid (t > 0)
    nl = (t != seq_len - 1).astype(jnp.float32)   # right tap valid (t < T-1)

    def stream(v, w_ref2, b_ref2):
        # v: (dim, Lb) bf16 unshifted activations of one stream.
        p = jnp.dot(w_ref2[...], v, preferred_element_type=jnp.float32)
        p0 = p[:dim, :]            # tap 0: needs x[t-1] -> shift result by +1
        p1 = p[dim:2 * dim, :]     # tap 1: x[t]
        p2 = p[2 * dim:, :]        # tap 2: needs x[t+1] -> shift result by -1
        return (pltpu.roll(p0, shift=1, axis=1) * nf
                + p1
                + pltpu.roll(p2, shift=Lb - 1, axis=1) * nl
                + b_ref2[...])

    y_flow = stream(x[:dim, :], wf_ref, bf_ref)    # branches [a; b]
    y_rgb = stream(x[dim:, :], wr_ref, br_ref)     # branches [c; d]

    o_ref[:dim, :] = (y_flow * m).astype(o_ref.dtype)
    o_ref[dim:, :] = (y_rgb * m).astype(o_ref.dtype)


def decouple_net(feats, mask, w, bias, *, target_lanes=1024):
    """feats: (B, input_dim, T) f32, mask: (B, 1, T) bool,
    w: (4, 3, cout, dim) f32 with dim = input_dim // 2, cout = dim // 2,
    bias: (4, cout) f32.  Returns (B, input_dim, T) f32."""
    B, C, T = feats.shape
    dim = C // 2
    cout = dim // 2
    assert w.shape == (4, 3, cout, dim) and bias.shape == (4, cout)

    # ---- host-side packing: weight fusion, bf16 cast, batch -> lane fold ----
    w_bf = w.astype(jnp.bfloat16)
    # (branch, tap, o, i) -> (tap, branch, o, i) -> (3*dim, dim)
    w_flow = w_bf[0:2].transpose(1, 0, 2, 3).reshape(3 * dim, dim)
    w_rgb = w_bf[2:4].transpose(1, 0, 2, 3).reshape(3 * dim, dim)
    b_flow = bias[0:2].reshape(2 * cout, 1).astype(jnp.float32)
    b_rgb = bias[2:4].reshape(2 * cout, 1).astype(jnp.float32)

    x2d = jnp.transpose(feats, (1, 0, 2)).reshape(C, B * T).astype(jnp.bfloat16)
    m2d = jnp.transpose(mask, (1, 0, 2)).reshape(1, B * T).astype(jnp.float32)

    # Whole sequences per grid step; keep lane width near `target_lanes` so
    # per-step overhead is amortized while the block stays small enough for
    # the v7x / v5e scoped-VMEM defaults.  Conv halos never cross a block
    # because blocks start at sequence boundaries.
    block_b = 1
    for d in range(min(B, max(1, target_lanes // T)), 0, -1):
        if B % d == 0:
            block_b = d
            break
    lb = block_b * T
    grid = (B // block_b,)

    flops = 2 * 2 * (3 * dim) * dim * (B * T)       # two (3*dim, dim)@(dim, B*T)
    bytes_accessed = (B * C * T * 2          # feats bf16 in
                      + B * T * 4            # mask f32 in
                      + B * C * T * 4        # output f32
                      + 2 * 3 * dim * dim * 2  # weights bf16
                      + 2 * dim * 4)           # biases f32

    out2d = pl.pallas_call(
        functools.partial(decouple_kernel, seq_len=T),
        out_shape=jax.ShapeDtypeStruct((C, B * T), jnp.float32),
        grid_spec=pltpu.PrefetchScalarGridSpec(
            num_scalar_prefetch=0,
            grid=grid,
            in_specs=[
                pl.BlockSpec((C, lb), lambda g: (0, g)),
                pl.BlockSpec((1, lb), lambda g: (0, g)),
                pl.BlockSpec((3 * dim, dim), lambda g: (0, 0)),
                pl.BlockSpec((3 * dim, dim), lambda g: (0, 0)),
                pl.BlockSpec((2 * cout, 1), lambda g: (0, 0)),
                pl.BlockSpec((2 * cout, 1), lambda g: (0, 0)),
            ],
            out_specs=pl.BlockSpec((C, lb), lambda g: (0, g)),
        ),
        compiler_params=pltpu.CompilerParams(
            dimension_semantics=("parallel",)),
        cost_estimate=pl.CostEstimate(
            flops=flops, transcendentals=0, bytes_accessed=bytes_accessed),
    )(x2d, m2d, w_flow, w_rgb, b_flow, b_rgb)

    # (C, B*T) -> (B, C, T)
    return jnp.transpose(out2d.reshape(C, B, T), (1, 0, 2))


def ref_forward(feats, mask, w, bias):
    """Pure-JAX reference of DecoupleNet.forward (with_ln=False)."""
    B, C, T = feats.shape
    dim = C // 2
    flow = feats[:, :dim, :]
    rgb = feats[:, dim:, :]
    mask_f = mask.astype(feats.dtype)
    inputs = (flow, flow, rgb, rgb)
    outs = []
    for i in range(4):
        Wt = jnp.transpose(w[i], (1, 2, 0))      # (Cout, Cin, 3)
        y = jax.lax.conv_general_dilated(
            inputs[i], Wt, window_strides=(1,), padding=((1, 1),),
            dimension_numbers=('NCH', 'OIH', 'NCH'),
            precision=jax.lax.Precision.HIGHEST)
        y = (y + bias[i][None, :, None]) * mask_f
        outs.append(y)
    return jnp.concatenate(outs, axis=1)


if __name__ == "__main__":
    # Small shapes consistent with the module: feats (B, input_dim, T), mask (B, 1, T)
    B, input_dim, T = 2, 32, 128
    dim = input_dim // 2          # 16  (per-stream channels)
    cout = dim // 2               # 8   (per-branch output channels)

    key = jax.random.PRNGKey(0)
    k_feat, k_w, k_b = jax.random.split(key, 3)

    feats = jax.random.normal(k_feat, (B, input_dim, T), dtype=jnp.float32)

    # Valid-length mask (bool), second sequence only half valid.
    lengths = jnp.array([T, T // 2], dtype=jnp.int32)
    mask = jnp.arange(T)[None, None, :] < lengths[:, None, None]   # (B, 1, T)

    # Conv1d-style uniform weights; small random bias to exercise the bias path.
    fan_in = dim * 3
    bound = 1.0 / np.sqrt(fan_in)
    w = jax.random.uniform(k_w, (4, 3, cout, dim), minval=-bound, maxval=bound,
                           dtype=jnp.float32)
    bias = 0.1 * jax.random.normal(k_b, (4, cout), dtype=jnp.float32)

    out = jax.block_until_ready(decouple_net(feats, mask, w, bias))

    # Reference runs a full-precision f32 conv on the same bf16-rounded
    # operands the kernel consumes (the kernel accumulates in f32).
    feats_r = feats.astype(jnp.bfloat16).astype(jnp.float32)
    w_r = w.astype(jnp.bfloat16).astype(jnp.float32)
    ref = ref_forward(feats_r, mask, w_r, bias)

    np.testing.assert_allclose(np.asarray(out), np.asarray(ref),
                               rtol=2e-3, atol=2e-4)
    assert out.shape == (B, input_dim, T)
    print("KERNEL_OK")
</pallas_src>

<mosaic_0001>
module attributes {stable_mosaic.version = 11 : i64} {
  func.func @decouple_kernel(%arg0: i32, %arg1: memref<32x256xbf16, #tpu.memory_space<vmem>>, %arg2: memref<1x256xf32, #tpu.memory_space<vmem>>, %arg3: memref<48x16xbf16, #tpu.memory_space<vmem>>, %arg4: memref<48x16xbf16, #tpu.memory_space<vmem>>, %arg5: memref<16x1xf32, #tpu.memory_space<vmem>>, %arg6: memref<16x1xf32, #tpu.memory_space<vmem>>, %arg7: memref<32x256xf32, #tpu.memory_space<vmem>>) attributes {dimension_semantics = [#tpu.dimension_semantics<parallel>], iteration_bounds = array<i64: 1>, scalar_prefetch = 0 : i64, scratch_operands = 0 : i64, tpu.core_type = #tpu.core_type<tc>, window_params = [{transform_indices = @transform_0, window_bounds = array<i64: 32, 256>}, {transform_indices = @transform_1, window_bounds = array<i64: 1, 256>}, {pipeline_mode = #tpu.pipeline_mode<synchronous>, transform_indices = @transform_2, window_bounds = array<i64: 48, 16>}, {pipeline_mode = #tpu.pipeline_mode<synchronous>, transform_indices = @transform_3, window_bounds = array<i64: 48, 16>}, {pipeline_mode = #tpu.pipeline_mode<synchronous>, transform_indices = @transform_4, window_bounds = array<i64: 16, 1>}, {pipeline_mode = #tpu.pipeline_mode<synchronous>, transform_indices = @transform_5, window_bounds = array<i64: 16, 1>}, {transform_indices = @transform_6, window_bounds = array<i64: 32, 256>}]} {
    %c0 = arith.constant 0 : index
    %c0_0 = arith.constant 0 : index
    %0 = vector.load %arg1[%c0, %c0_0] : memref<32x256xbf16, #tpu.memory_space<vmem>>, vector<32x256xbf16>
    %c0_1 = arith.constant 0 : index
    %c0_2 = arith.constant 0 : index
    %1 = vector.load %arg2[%c0_1, %c0_2] : memref<1x256xf32, #tpu.memory_space<vmem>>, vector<1x256xf32>
    %2 = tpu.iota {dimensions = array<i32: 1>} : vector<1x256xi32>
    %c128_i32 = arith.constant 128 : i32
    %c0_i32 = arith.constant 0 : i32
    %3 = arith.cmpi eq, %c128_i32, %c0_i32 : i32
    %c1_i32 = arith.constant 1 : i32
    %4 = arith.select %3, %c1_i32, %c128_i32 : i32
    %5 = vector.broadcast %4 : i32 to vector<1x256xi32>
    %6 = arith.remsi %2, %5 : vector<1x256xi32>
    %c0_i32_3 = arith.constant 0 : i32
    %7 = vector.broadcast %c0_i32_3 : i32 to vector<1x256xi32>
    %8 = arith.cmpi ne, %6, %7 : vector<1x256xi32>
    %c0_i32_4 = arith.constant 0 : i32
    %9 = vector.broadcast %c0_i32_4 : i32 to vector<1x256xi32>
    %10 = arith.cmpi slt, %6, %9 : vector<1x256xi32>
    %c0_i32_5 = arith.constant 0 : i32
    %11 = arith.cmpi slt, %4, %c0_i32_5 : i32
    %12 = vector.broadcast %11 : i1 to vector<1x256xi1>
    %13 = vector.broadcast %12 : vector<1x256xi1> to vector<1x256xi1>
    %14 = arith.xori %10, %13 : vector<1x256xi1>
    %15 = arith.andi %14, %8 : vector<1x256xi1>
    %16 = vector.broadcast %4 : i32 to vector<1x256xi32>
    %17 = arith.addi %6, %16 : vector<1x256xi32>
    %18 = arith.select %15, %17, %6 : vector<1x256xi1>, vector<1x256xi32>
    %c0_i32_6 = arith.constant 0 : i32
    %19 = vector.broadcast %c0_i32_6 : i32 to vector<1x256xi32>
    %20 = arith.cmpi ne, %18, %19 : vector<1x256xi32>
    %21 = arith.extui %20 : vector<1x256xi1> to vector<1x256xi32>
    %22 = arith.sitofp %21 : vector<1x256xi32> to vector<1x256xf32>
    %c127_i32 = arith.constant 127 : i32
    %23 = vector.broadcast %c127_i32 : i32 to vector<1x256xi32>
    %24 = arith.cmpi ne, %18, %23 : vector<1x256xi32>
    %25 = arith.extui %24 : vector<1x256xi1> to vector<1x256xi32>
    %26 = arith.sitofp %25 : vector<1x256xi32> to vector<1x256xf32>
    %27 = vector.extract_strided_slice %0 {offsets = [0, 0], sizes = [16, 256], strides = [1, 1]} : vector<32x256xbf16> to vector<16x256xbf16>
    %c0_7 = arith.constant 0 : index
    %c0_8 = arith.constant 0 : index
    %28 = vector.load %arg3[%c0_7, %c0_8] : memref<48x16xbf16, #tpu.memory_space<vmem>>, vector<48x16xbf16>
    %cst = arith.constant dense<0.000000e+00> : vector<48x256xf32>
    %29 = tpu.matmul %28, %27, %cst {dimension_numbers = #tpu.dot_dimension_numbers<[1], [0], [0], [1], [0, 0, 1, 1], [], []>} : vector<48x16xbf16>, vector<16x256xbf16>, vector<48x256xf32> -> vector<48x256xf32>
    %30 = vector.extract_strided_slice %29 {offsets = [0, 0], sizes = [16, 256], strides = [1, 1]} : vector<48x256xf32> to vector<16x256xf32>
    %31 = vector.extract_strided_slice %29 {offsets = [16, 0], sizes = [16, 256], strides = [1, 1]} : vector<48x256xf32> to vector<16x256xf32>
    %32 = vector.extract_strided_slice %29 {offsets = [32, 0], sizes = [16, 256], strides = [1, 1]} : vector<48x256xf32> to vector<16x256xf32>
    %c1_i32_9 = arith.constant 1 : i32
    %33 = tpu.dynamic_rotate %30 by %c1_i32_9 dim 1 : vector<16x256xf32>, i32 -> vector<16x256xf32>
    %34 = vector.broadcast %22 : vector<1x256xf32> to vector<16x256xf32>
    %35 = arith.mulf %33, %34 : vector<16x256xf32>
    %36 = arith.addf %35, %31 : vector<16x256xf32>
    %c255_i32 = arith.constant 255 : i32
    %37 = tpu.dynamic_rotate %32 by %c255_i32 dim 1 : vector<16x256xf32>, i32 -> vector<16x256xf32>
    %38 = vector.broadcast %26 : vector<1x256xf32> to vector<16x256xf32>
    %39 = arith.mulf %37, %38 : vector<16x256xf32>
    %40 = arith.addf %36, %39 : vector<16x256xf32>
    %c0_10 = arith.constant 0 : index
    %c0_11 = arith.constant 0 : index
    %41 = vector.load %arg5[%c0_10, %c0_11] : memref<16x1xf32, #tpu.memory_space<vmem>>, vector<16x1xf32>
    %42 = vector.broadcast %41 : vector<16x1xf32> to vector<16x256xf32>
    %43 = arith.addf %40, %42 : vector<16x256xf32>
    %44 = vector.extract_strided_slice %0 {offsets = [16, 0], sizes = [16, 256], strides = [1, 1]} : vector<32x256xbf16> to vector<16x256xbf16>
    %c0_12 = arith.constant 0 : index
    %c0_13 = arith.constant 0 : index
    %45 = vector.load %arg4[%c0_12, %c0_13] : memref<48x16xbf16, #tpu.memory_space<vmem>>, vector<48x16xbf16>
    %cst_14 = arith.constant dense<0.000000e+00> : vector<48x256xf32>
    %46 = tpu.matmul %45, %44, %cst_14 {dimension_numbers = #tpu.dot_dimension_numbers<[1], [0], [0], [1], [0, 0, 1, 1], [], []>} : vector<48x16xbf16>, vector<16x256xbf16>, vector<48x256xf32> -> vector<48x256xf32>
    %47 = vector.extract_strided_slice %46 {offsets = [0, 0], sizes = [16, 256], strides = [1, 1]} : vector<48x256xf32> to vector<16x256xf32>
    %48 = vector.extract_strided_slice %46 {offsets = [16, 0], sizes = [16, 256], strides = [1, 1]} : vector<48x256xf32> to vector<16x256xf32>
    %49 = vector.extract_strided_slice %46 {offsets = [32, 0], sizes = [16, 256], strides = [1, 1]} : vector<48x256xf32> to vector<16x256xf32>
    %c1_i32_15 = arith.constant 1 : i32
    %50 = tpu.dynamic_rotate %47 by %c1_i32_15 dim 1 : vector<16x256xf32>, i32 -> vector<16x256xf32>
    %51 = vector.broadcast %22 : vector<1x256xf32> to vector<16x256xf32>
    %52 = arith.mulf %50, %51 : vector<16x256xf32>
    %53 = arith.addf %52, %48 : vector<16x256xf32>
    %c255_i32_16 = arith.constant 255 : i32
    %54 = tpu.dynamic_rotate %49 by %c255_i32_16 dim 1 : vector<16x256xf32>, i32 -> vector<16x256xf32>
    %55 = vector.broadcast %26 : vector<1x256xf32> to vector<16x256xf32>
    %56 = arith.mulf %54, %55 : vector<16x256xf32>
    %57 = arith.addf %53, %56 : vector<16x256xf32>
    %c0_17 = arith.constant 0 : index
    %c0_18 = arith.constant 0 : index
    %58 = vector.load %arg6[%c0_17, %c0_18] : memref<16x1xf32, #tpu.memory_space<vmem>>, vector<16x1xf32>
    %59 = vector.broadcast %58 : vector<16x1xf32> to vector<16x256xf32>
    %60 = arith.addf %57, %59 : vector<16x256xf32>
    %61 = vector.broadcast %1 : vector<1x256xf32> to vector<16x256xf32>
    %62 = arith.mulf %43, %61 : vector<16x256xf32>
    %c0_19 = arith.constant 0 : index
    %c0_20 = arith.constant 0 : index
    %63 = vector.load %arg7[%c0_19, %c0_20] : memref<32x256xf32, #tpu.memory_space<vmem>>, vector<16x256xf32>
    tpu.vector_store %arg7[%c0_19, %c0_20], %62 {strides = array<i32>} : memref<32x256xf32, #tpu.memory_space<vmem>>, vector<16x256xf32>,
    %64 = vector.broadcast %1 : vector<1x256xf32> to vector<16x256xf32>
    %65 = arith.mulf %60, %64 : vector<16x256xf32>
    %c16 = arith.constant 16 : index
    %c0_21 = arith.constant 0 : index
    %66 = vector.load %arg7[%c16, %c0_21] : memref<32x256xf32, #tpu.memory_space<vmem>>, vector<16x256xf32>
    tpu.vector_store %arg7[%c16, %c0_21], %65 {strides = array<i32>} : memref<32x256xf32, #tpu.memory_space<vmem>>, vector<16x256xf32>,
    return
  }
  func.func @transform_0(%arg0: i32) -> (i32, i32) {
    %c0_i32 = arith.constant 0 : i32
    %c0_i32_0 = arith.constant 0 : i32
    return %c0_i32, %arg0 : i32, i32
  }
  func.func @transform_1(%arg0: i32) -> (i32, i32) {
    %c0_i32 = arith.constant 0 : i32
    %c0_i32_0 = arith.constant 0 : i32
    return %c0_i32, %arg0 : i32, i32
  }
  func.func @transform_2(%arg0: i32) -> (i32, i32) {
    %c0_i32 = arith.constant 0 : i32
    %c0_i32_0 = arith.constant 0 : i32
    %c0_i32_1 = arith.constant 0 : i32
    return %c0_i32, %c0_i32_0 : i32, i32
  }
  func.func @transform_3(%arg0: i32) -> (i32, i32) {
    %c0_i32 = arith.constant 0 : i32
    %c0_i32_0 = arith.constant 0 : i32
    %c0_i32_1 = arith.constant 0 : i32
    return %c0_i32, %c0_i32_0 : i32, i32
  }
  func.func @transform_4(%arg0: i32) -> (i32, i32) {
    %c0_i32 = arith.constant 0 : i32
    %c0_i32_0 = arith.constant 0 : i32
    %c0_i32_1 = arith.constant 0 : i32
    return %c0_i32, %c0_i32_0 : i32, i32
  }
  func.func @transform_5(%arg0: i32) -> (i32, i32) {
    %c0_i32 = arith.constant 0 : i32
    %c0_i32_0 = arith.constant 0 : i32
    %c0_i32_1 = arith.constant 0 : i32
    return %c0_i32, %c0_i32_0 : i32, i32
  }
  func.func @transform_6(%arg0: i32) -> (i32, i32) {
    %c0_i32 = arith.constant 0 : i32
    %c0_i32_0 = arith.constant 0 : i32
    return %c0_i32, %arg0 : i32, i32
  }
}

</mosaic_0001>

<bundles_post_ra>
// kernel: tpu_custom_call.1
= control target key start
LH: loop header
LB: loop body
LE: loop exit
PB: predicated region body
PF: predicated region fallthrough
CT: control target
= control target key end

     0   :  { %vm100_vm0 = vcmask 130048   ;;  %s694_s0 = inlined_call_operand.vmem [shape: bf16[32,256], index: 0, kind: input, shape index: {}]   ;;  %s695_s1 = inlined_call_operand.vmem [shape: f32[1,256], index: 1, kind: input, shape index: {}]   ;;  %s696_s2 = inlined_call_operand.vmem [shape: bf16[48,16], index: 2, kind: input, shape index: {}]   ;;  %s697_s3 = inlined_call_operand.vmem [shape: bf16[48,16], index: 3, kind: input, shape index: {}]   ;;  %s698_s4 = inlined_call_operand.vmem [shape: f32[16,1], index: 4, kind: input, shape index: {}]   ;;  %s699_s5 = inlined_call_operand.vmem [shape: f32[16,1], index: 5, kind: input, shape index: {}]   ;;  %s700_s6 = inlined_call_operand.hbm [shape: f32[32,256], index: 6, kind: output, shape index: {}]  }
   0x1   :  { %v417_v0 = vld [vmem:[%s694_s0] sm:$0xf]  ;;  %v456_v1 = vld [vmem:[%s694_s0 + $0x4] sm:$0xf0]  ;;  %v455_v2 = vld [vmem:[%s694_s0 + $0x4] sm:$0xf] }
   0x2   :  { %v418_v3 = vor.u32 %v456_v1, %v417_v0  ;;  %v419_v4 = vld [vmem:[%s694_s0 + $0x8] sm:$0xf0]  ;;  %v443_v5 = vld [vmem:[%s694_s0 + $0x10] sm:$0xf]  ;;  %v458_v6 = vld [vmem:[%s694_s0 + $0x14] sm:$0xf0] }
   0x3   :  { %v422_v7 = vor.u32 %v455_v2, %v419_v4  ;;  %v444_v8 = vor.u32 %v458_v6, %v443_v5  ;;  %v457_v9 = vld [vmem:[%s694_s0 + $0x14] sm:$0xf]  ;;  %v445_v10 = vld [vmem:[%s694_s0 + $0x18] sm:$0xf0]  ;;  %v459_v11 = vld [vmem:[%s696_s2] sm:$0xff] }
   0x4   :  { %117 = vmatpush.bf16.msra.mxu0 %v418_v3  ;;  %v448_v12 = vor.u32 %v457_v9, %v445_v10  ;;  %v462_v13 = vld [vmem:[%s697_s3] sm:$0xff] }
   0x5   :  { %141 = vmatpush.bf16.msra.mxu1 %v422_v7  ;;  %263 = vmatpush.bf16.msra.mxu2 %v444_v8 }
   0x6   :  { %11 = vsyncpa [#allocation3], 0  ;;  %287 = vmatpush.bf16.msra.mxu3 %v448_v12  ;;  %v200_v14 = vld [vmem:[%s698_s4] sm:$0xff]  ;;  %v501_v15 = vmov 0   ;;  %v460_v16 = vld [vmem:[%s696_s2 + $0x8] sm:$0xff]  ;;  %s502_s26 = smov 1   ;;  %v30_v51 = vlaneseq }
   0x7   :  { %423 = vmatmul.msk.bf16.vlgmr.msra.gmra.mxu0 %vm100_vm0, %v459_v11  ;;  %472 = vset.pattern.permute.xlu1 %v501_v15  ;;  %v463_v17 = vld [vmem:[%s697_s3 + $0x8] sm:$0xff]  ;;  %v461_v18 = vld [vmem:[%s696_s2 + $0x10] sm:$0xff]  ;;  %s503_s2 = smov 127   ;;  %v344_v44 = vld [vmem:[%s699_s5] sm:$0xff]  ;;  %v504_v61 = vmov 0.0   ;;  %s387_s11 = sshll.u32 %s700_s6, 4  ;;  %s388_s11 = int_to_ptr.hbm [resolvable:$true] %s387_s11 }
   0x8   :  { %426 = vmatmul.msk.bf16.vlgmr.msra.gmra.mxu1 %vm100_vm0, %v459_v11  ;;  %449 = vmatmul.msk.bf16.vlgmr.msra.gmra.mxu2 %vm100_vm0, %v462_v13  ;;  %v464_v19 = vld [vmem:[%s697_s3 + $0x10] sm:$0xff]  ;;  %v345_v43 = vld [vmem:[%s699_s5 + $0x8] sm:$0xff]  ;;  %v627_v53 = vand.u32 127, %v30_v51  ;;  %v29_v12 = vld [vmem:[%s695_s1] sm:$0x3]  ;;  %s505_s1 = smov [#allocation2]  }
   0x9   :  { %452 = vmatmul.msk.bf16.vlgmr.msra.gmra.mxu3 %vm100_vm0, %v462_v13  ;;  %474 = vset.pattern.permute.xlu0 %v501_v15  ;;  %v201_v46 = vld [vmem:[%s698_s4 + $0x8] sm:$0xff]  ;;  %s385_s8 = sshll.u32 %s505_s1, 4  ;;  %s506_s12 = smov 256   ;;  %s386_s8 = int_to_ptr.vmem [resolvable:$true] %s385_s8 }
   0xa   :  { %204 = vperm.xlu1 %472, %v200_v14   ;;  %473 = vset.pattern.permute.xlu2 %v501_v15  ;;  %v32_v55 = vadd.s32 128, %v627_v53  ;;  %vm57_vm1 = vcmp.ne.s32.totalorder %v627_v53, 0  ;;  %vm166_vm3 = vcmp.lt.s32.totalorder %v627_v53, 1  ;;  %vm63_vm4 = vcmp.ne.s32.totalorder %v627_v53, 127  ;;  %s507_s13 = smov 16  }
   0xb   :  { %v399_v62 = vsel %vm57_vm1, 1.0, %v504_v61  ;;  %vm187_vm6 = vcmp.lt.s32.totalorder %v627_v53, 127  ;;  %v401_v7 = vsel %vm63_vm4, 1.0, %v504_v61 }
   0xc   :  { %v44_v58 = vand.u32 127, %v32_v55 }
   0xe   :  { %vm58_vm2 = vcmp.ne.s32.totalorder %v44_v58, 0  ;;  %vm64_vm5 = vcmp.ne.s32.totalorder %v44_v58, 127 }
   0xf   :  { %v400_v63 = vsel %vm58_vm2, 1.0, %v504_v61  ;;  %v402_v8 = vsel %vm64_vm5, 1.0, %v504_v61 }
  0x17   :  { %424 = vmatmul.msk.bf16.gmra.mxu0 %vm100_vm0, %v460_v16 }
  0x18   :  { %427 = vmatmul.msk.bf16.gmra.mxu1 %vm100_vm0, %v460_v16  ;;  %450 = vmatmul.msk.bf16.gmra.mxu2 %vm100_vm0, %v463_v17 }
  0x19   :  { %453 = vmatmul.msk.bf16.gmra.mxu3 %vm100_vm0, %v463_v17 }
  0x27   :  { %425 = vmatmul.msk.bf16.gmra.mxu0 %vm100_vm0, %v461_v18 }
  0x28   :  { %428 = vmatmul.msk.bf16.gmra.mxu1 %vm100_vm0, %v461_v18  ;;  %451 = vmatmul.msk.bf16.gmra.mxu2 %vm100_vm0, %v464_v19 }
  0x29   :  { %454 = vmatmul.msk.bf16.gmra.mxu3 %vm100_vm0, %v464_v19 }
  0x7c   :  { %v205_v47 = vpop.permute.xlu1 %204 }
  0x84   :  { %v119_v20 = vpop.f32.mrf.mxu0 }
  0x85   :  { %v143_v21 = vpop.f32.mrf.mxu1  ;;  %158 = vrot.lane.b32.xlu0 %v119_v20, %s502_s26 }
  0x86   :  { %162 = vrot.lane.b32.xlu1 %v143_v21, %s502_s26 }
  0x8b   :  { %v265_v22 = vpop.f32.mrf.mxu2 }
  0x8c   :  { %v289_v23 = vpop.f32.mrf.mxu3  ;;  %v121_v24 = vpop.f32.mrf.mxu0 }
  0x8d   :  { %v145_v25 = vpop.f32.mrf.mxu1  ;;  %308 = vrot.lane.b32.xlu0 %v289_v23, %s502_s26 }
  0x8e   :  { %304 = vrot.lane.b32.xlu1 %v265_v22, %s502_s26 }
  0x93   :  { %v267_v26 = vpop.f32.mrf.mxu2 }
  0x94   :  { %v291_v27 = vpop.f32.mrf.mxu3  ;;  %306 = vrot.lane.b32.xlu2 %v267_v26, %s502_s26  ;;  %v600_v28 = vpop.f32.mrf.mxu0 }
  0x95   :  { %v602_v29 = vpop.f32.mrf.mxu1  ;;  %160 = vrot.lane.b32.xlu0 %v121_v24, %s502_s26  ;;  %v361_v24 = vperm.slane %v29_v12, 0 }
  0x96   :  { %164 = vrot.lane.b32.xlu1 %v145_v25, %s502_s26  ;;  %v362_v25 = vperm.slane %v29_v12, 1 }
  0x9b   :  { %v604_v30 = vpop.f32.mrf.mxu2 }
  0x9c   :  { %v606_v31 = vpop.f32.mrf.mxu3  ;;  %v608_v32 = vpop.f32.mrf.mxu0 }
  0x9d   :  { %v610_v33 = vpop.f32.mrf.mxu1 }
  0x9e   :  { %310 = vrot.lane.b32.xlu1 %v291_v27, %s502_s26 }
  0xa3   :  { %v612_v34 = vpop.f32.mrf.mxu2 }
  0xa4   :  { %v614_v35 = vpop.f32.mrf.mxu3  ;;  %v129_v36 = vpop.f32.mrf.mxu0 }
  0xa5   :  { %v153_v37 = vpop.f32.mrf.mxu1  ;;  %179 = vrot.lane.b32.xlu2 %v129_v36, %s503_s2 }
  0xa6   :  { %183 = vrot.lane.b32.xlu0 %v153_v37, %s503_s2 }
  0xab   :  { %v275_v38 = vpop.f32.mrf.mxu2 }
  0xac   :  { %v299_v39 = vpop.f32.mrf.mxu3  ;;  %v131_v40 = vpop.f32.mrf.mxu0 }
  0xad   :  { %328 = vrot.lane.b32.xlu2 %v299_v39, %s503_s2  ;;  %v155_v45 = vpop.f32.mrf.mxu1 }
  0xae   :  { %324 = vrot.lane.b32.xlu0 %v275_v38, %s503_s2 }
  0xb3   :  { %v277_v41 = vpop.f32.mrf.mxu2 }
  0xb4   :  { %326 = vrot.lane.b32.xlu1 %v277_v41, %s503_s2  ;;  %v301_v42 = vpop.f32.mrf.mxu3 }
  0xb5   :  { %181 = vrot.lane.b32.xlu2 %v131_v40, %s503_s2 }
  0xb6   :  { %330 = vrot.lane.b32.xlu0 %v301_v42, %s503_s2 }
  0xbc   :  { %353 = vperm.xlu1 %472, %v345_v43  }
  0xbd   :  { %185 = vrot.lane.b32.xlu2 %v155_v45, %s503_s2 }
  0xbe   :  { %348 = vperm.xlu0 %474, %v344_v44  }
  0xc5   :  { %209 = vperm.xlu2 %473, %v201_v46  }
  0xee   :  { %v625_v48 = vpop.permute.xlu2 %306 }
  0xf7   :  { %v159_v49 = vpop.permute.xlu0 %158 }
  0xf8   :  { %v163_v50 = vpop.permute.xlu1 %162 }
  0xf9   :  { %v167_v0 = vsel %vm166_vm3, %v159_v49, %v163_v50  ;;  %v169_v1 = vsel %vm166_vm3, %v163_v50, %v159_v49 }
  0xfa   :  { %v171_v3 = vmul.f32 %v399_v62, %v169_v1  ;;  %v172_v4 = vmul.f32 %v400_v63, %v167_v0 }
  0xfc   :  { %v175_v16 = vadd.f32 %v171_v3, %v600_v28  ;;  %v176_v17 = vadd.f32 %v172_v4, %v602_v29 }
  0xff   :  { %v180_v52 = vpop.permute.xlu2 %179  ;;  %v629_v54 = vpop.permute.xlu0 %308 }
 0x100   :  { %v634_v57 = vpop.permute.xlu1 %304 }
 0x101   :  { %v314_v51 = vsel %vm166_vm3, %v629_v54, %v634_v57 }
 0x102   :  { %v316_v61 = vmul.f32 %v399_v62, %v314_v51 }
 0x107   :  { %v632_v56 = vpop.permute.xlu2 %328  ;;  %v161_v60 = vpop.permute.xlu0 %160 }
 0x108   :  { %v165_v2 = vpop.permute.xlu1 %164 }
 0x109   :  { %v168_v5 = vsel %vm166_vm3, %v161_v60, %v165_v2  ;;  %v170_v6 = vsel %vm166_vm3, %v165_v2, %v161_v60 }
 0x10a   :  { %v173_v10 = vmul.f32 %v399_v62, %v170_v6  ;;  %v174_v11 = vmul.f32 %v400_v63, %v168_v5 }
 0x10c   :  { %v177_v36 = vadd.f32 %v173_v10, %v608_v32  ;;  %v178_v28 = vadd.f32 %v174_v11, %v610_v33 }
 0x10f   :  { %v182_v59 = vpop.permute.xlu2 %181 }
 0x110   :  { %v311_v37 = vpop.permute.xlu1 %310 }
 0x111   :  { %v313_v32 = vsel %vm166_vm3, %v625_v48, %v311_v37  ;;  %v315_v33 = vsel %vm166_vm3, %v311_v37, %v625_v48 }
 0x112   :  { %v319_v55 = vmul.f32 %v400_v63, %v313_v32 }
 0x114   :  { %v323_v4 = vadd.f32 %v319_v55, %v614_v35 }
 0x117   :  { %v186_v9 = vpop.permute.xlu2 %185 }
 0x118   :  { %v184_v13 = vpop.permute.xlu0 %183  ;;  %v189_v14 = vsel %vm187_vm6, %v182_v59, %v186_v9  ;;  %v191_v15 = vsel %vm187_vm6, %v186_v9, %v182_v59 }
 0x119   :  { %v188_v18 = vsel %vm187_vm6, %v180_v52, %v184_v13  ;;  %v190_v19 = vsel %vm187_vm6, %v184_v13, %v180_v52  ;;  %v194_v22 = vmul.f32 %v401_v7, %v189_v14  ;;  %v195_v23 = vmul.f32 %v402_v8, %v191_v15 }
 0x11a   :  { %v192_v20 = vmul.f32 %v401_v7, %v188_v18  ;;  %v193_v21 = vmul.f32 %v402_v8, %v190_v19  ;;  %v318_v52 = vmul.f32 %v399_v62, %v315_v33 }
 0x11b   :  { %v198_v39 = vadd.f32 %v194_v22, %v177_v36  ;;  %v199_v40 = vadd.f32 %v195_v23, %v178_v28 }
 0x11c   :  { %v196_v26 = vadd.f32 %v192_v20, %v175_v16  ;;  %v197_v27 = vadd.f32 %v193_v21, %v176_v17  ;;  %v322_v3 = vadd.f32 %v318_v52, %v612_v34 }
 0x11e   :  { %v212_v29 = vadd.f32 %v205_v47, %v196_v26  ;;  %v213_v38 = vadd.f32 %v205_v47, %v197_v27  ;;  %v312_v47 = vsel %vm166_vm3, %v634_v57, %v629_v54 }
 0x11f   :  { %v210_v41 = vpop.permute.xlu2 %209  ;;  %v317_v0 = vmul.f32 %v400_v63, %v312_v47 }
 0x120   :  { %v365_v42 = vmul.f32 %v361_v24, %v212_v29  ;;  %v366_v43 = vmul.f32 %v362_v25, %v213_v38  ;;  %v325_v44 = vpop.permute.xlu0 %324  ;;  %v214_v45 = vadd.f32 %v210_v41, %v198_v39  ;;  %v215_v46 = vadd.f32 %v210_v41, %v199_v40 }
 0x121   :  { %v332_v48 = vsel %vm187_vm6, %v325_v44, %v632_v56  ;;  %v334_v59 = vsel %vm187_vm6, %v632_v56, %v325_v44  ;;  %v320_v56 = vadd.f32 %v316_v61, %v604_v30  ;;  %v321_v62 = vadd.f32 %v317_v0, %v606_v31 }
 0x122   :  { %369 = vst [vmem:[#allocation2] sm:$0xff] %v365_v42  ;;  %v367_v49 = vmul.f32 %v361_v24, %v214_v45  ;;  %v368_v50 = vmul.f32 %v362_v25, %v215_v46  ;;  %v336_v5 = vmul.f32 %v401_v7, %v332_v48  ;;  %v337_v6 = vmul.f32 %v402_v8, %v334_v59 }
 0x123   :  { %370 = vst [vmem:[#allocation2 + $0x8] sm:$0xff] %v366_v43 }
 0x124   :  { %371 = vst [vmem:[#allocation2 + $0x10] sm:$0xff] %v367_v49  ;;  %v340_v13 = vadd.f32 %v336_v5, %v320_v56  ;;  %v341_v53 = vadd.f32 %v337_v6, %v321_v62 }
 0x125   :  { %372 = vst [vmem:[#allocation2 + $0x18] sm:$0xff] %v368_v50 }
 0x126   :  { %v327_v58 = vpop.permute.xlu1 %326 }
 0x128   :  { %v331_v60 = vpop.permute.xlu0 %330 }
 0x129   :  { %v333_v1 = vsel %vm187_vm6, %v327_v58, %v331_v60  ;;  %v335_v54 = vsel %vm187_vm6, %v331_v60, %v327_v58 }
 0x12a   :  { %v338_v57 = vmul.f32 %v401_v7, %v333_v1  ;;  %v339_v2 = vmul.f32 %v402_v8, %v335_v54 }
 0x12c   :  { %v342_v9 = vadd.f32 %v338_v57, %v322_v3  ;;  %v343_v10 = vadd.f32 %v339_v2, %v323_v4 }
 0x12e   :  { %v354_v63 = vpop.permute.xlu1 %353 }
 0x12f   :  { %v358_v11 = vadd.f32 %v354_v63, %v342_v9  ;;  %v359_v12 = vadd.f32 %v354_v63, %v343_v10 }
 0x130   :  { %v349_v14 = vpop.permute.xlu0 %348 }
 0x131   :  { %v375_v34 = vmul.f32 %v361_v24, %v358_v11  ;;  %v376_v35 = vmul.f32 %v362_v25, %v359_v12  ;;  %v356_v7 = vadd.f32 %v349_v14, %v340_v13  ;;  %v357_v8 = vadd.f32 %v349_v14, %v341_v53 }
 0x133   :  { %379 = vst [vmem:[#allocation2 + $0x30] sm:$0xff] %v375_v34  ;;  %v373_v30 = vmul.f32 %v361_v24, %v356_v7  ;;  %v374_v15 = vmul.f32 %v362_v25, %v357_v8 }
 0x134   :  { %380 = vst [vmem:[#allocation2 + $0x38] sm:$0xff] %v376_v35 }
 0x135   :  { %377 = vst [vmem:[#allocation2 + $0x20] sm:$0xff] %v373_v30 }
 0x136   :  { %378 = vst [vmem:[#allocation2 + $0x28] sm:$0xff] %v374_v15 }
 0x137   :  { %393 = dma.vmem_to_hbm [thread:$0]  %s386_s8, 1024, %s388_s11, [#allocation3], %s506_s12, %s506_s12, %s507_s13  }
 0x138   :  { %499 = dma.done.wait [#allocation3], 1024  }
 0x139   :  { %500 = vsyncadd [#allocation3], 4294966272 }
 0x13a   :  { %398 = vsyncpa [#allocation3], 1 }

</bundles_post_ra>
